<compile_context>
chip_gen: v7x
topology: tpu7x:2x2x1
jax: 0.10.0
libtpu: 0.0.40
codegen_flags: <defaults>
</compile_context>

<pallas_src>
import math

import jax
import jax.numpy as jnp
from jax.experimental import pallas as pl
from jax.experimental.pallas import tpu as pltpu


# ---------------------------------------------------------------------------
# DCT filter construction (deterministic, mirrors get_dct_filter1)
# ---------------------------------------------------------------------------
def _build_filter(pos, freq, POS):
    result = math.cos(math.pi * freq * (pos + 0.5) / POS) / math.sqrt(POS)
    if freq == 0:
        return result
    return result * math.sqrt(2)


def get_dct_filter1(tile_size_x, tile_size_y, mapper_x, mapper_y, channel):
    assert len(mapper_x) == len(mapper_y)
    assert channel % len(mapper_x) == 0
    c_part = channel // len(mapper_x)
    parts = []
    for u_x, v_y in zip(mapper_x, mapper_y):
        vals = jnp.array(
            [[_build_filter(t_x, u_x, tile_size_x) * _build_filter(t_y, v_y, tile_size_y)
              for t_y in range(tile_size_y)]
             for t_x in range(tile_size_x)],
            dtype=jnp.float32,
        )
        parts.append(jnp.broadcast_to(vals, (c_part, tile_size_x, tile_size_y)))
    return jnp.concatenate(parts, axis=0)


# ---------------------------------------------------------------------------
# Tiling / budget helpers
# ---------------------------------------------------------------------------
def _vmem_capacity_bytes():
    try:
        return int(pltpu.get_tpu_info().vmem_capacity_bytes)
    except Exception:
        return 64 << 20  # conservative: v7x per-TensorCore VMEM


def _pick_fold(C, HW):
    """Channel-fold factor g (divides C) making the lane dim g*HW dense."""
    if HW % 128 == 0:
        return 1
    for g in range(1, C + 1):                 # prefer 128-aligned lane dim
        if C % g == 0 and (g * HW) % 128 == 0:
            return g
    for g in range(1, C + 1):                 # else: at least ~2 KiB DMA rows
        if C % g == 0 and g * HW >= 512:
            return g
    return C


def _channel_tile_options(cg):
    """Legal channel-tile sizes: multiples of 8 dividing cg, or all of cg."""
    opts = [d for d in range(8, cg, 8) if cg % d == 0]
    opts.append(cg)
    return sorted(set(opts))


def _pick_tiles(N, Cg, L, x_itemsize, budget_bytes):
    row_bytes = L * x_itemsize
    opts = _channel_tile_options(Cg)
    tcg = opts[0]
    for d in opts:                            # largest channel tile within budget
        if d * row_bytes <= budget_bytes:
            tcg = d
    per_n = tcg * row_bytes
    tn_cap = max(1, budget_bytes // per_n)
    tn = 1
    for d in range(1, N + 1):                 # largest divisor of N within cap
        if N % d == 0 and d <= tn_cap:
            tn = d
    # Keep >= 2 grid steps so the second TensorCore (v7x megacore) has work.
    if N > 1 and (Cg // tcg) * (N // tn) < 2:
        for d in range(N // 2, 0, -1):
            if N % d == 0:
                tn = d
                break
    return tn, tcg


# ---------------------------------------------------------------------------
# Kernels
# ---------------------------------------------------------------------------
def _cdca_kernel_sum(x_ref, w_ref, o_ref):
    # x_ref: (TN, TCg, L); w_ref: (TCg, L); o_ref: (TN, TCg, 1)
    prod = x_ref[...].astype(jnp.float32) * w_ref[...].astype(jnp.float32)[None]
    o_ref[...] = jnp.sum(prod, axis=-1, keepdims=True)


def _make_segsum_kernel(g):
    # Folded-channel path: lane dim L = g*HW; per-channel sums via a 0/1
    # segment matrix on the MXU (keeps per-step work off the XLU).
    def kernel(x_ref, w_ref, s_ref, o_ref):
        tn, tcg, L = x_ref.shape
        prod = x_ref[...].astype(jnp.float32) * w_ref[...].astype(jnp.float32)[None]
        seg = jnp.dot(prod.reshape(tn * tcg, L), s_ref[...],
                      preferred_element_type=jnp.float32)
        o_ref[...] = seg.reshape(tn, tcg, g)
    return kernel


# ---------------------------------------------------------------------------
# Wrapper
# ---------------------------------------------------------------------------
def cdca_forward(x, weight):
    """x: (N, C, H, W); weight: (C, H, W) -> (N, C, 1, 1)."""
    assert x.ndim == 4, "x must been 4 dimensions, but got " + str(x.ndim)
    N, C, H, W = x.shape
    assert weight.shape == (C, H, W)
    HW = H * W

    # Fold g channels into the lane axis for lane-dense blocks.
    g = _pick_fold(C, HW)
    Cg = C // g
    L = g * HW
    x2 = x.reshape(N, Cg, L)
    w2 = weight.reshape(Cg, L)

    cap = _vmem_capacity_bytes()
    budget = min(16 << 20, cap // 5)          # ~16 MiB (v5e/v6e) / ~12 MiB (v7x)
    x_item = jnp.dtype(x.dtype).itemsize
    w_item = jnp.dtype(weight.dtype).itemsize
    TN, TCg = _pick_tiles(N, Cg, L, x_item, budget)

    # Channel-tile axis OUTER, batch-tile axis INNER: the weight block index
    # only depends on the outer axis, so its DMA is elided across the inner
    # loop (weight read from HBM exactly once).
    grid = (Cg // TCg, N // TN)

    x_spec = pl.BlockSpec((TN, TCg, L), lambda c, n: (n, c, 0))
    w_spec = pl.BlockSpec((TCg, L), lambda c, n: (c, 0))
    out_spec = pl.BlockSpec((TN, TCg, g), lambda c, n: (n, c, 0))

    x_blk = TN * TCg * L * x_item
    w_blk = TCg * L * w_item
    o_blk = TN * TCg * g * 4

    if g == 1:
        kernel = _cdca_kernel_sum
        in_specs = [x_spec, w_spec]
        operands = (x2, w2)
        s_bytes = 0
        flops = 2 * N * C * HW
    else:
        seg = (jnp.arange(L, dtype=jnp.int32)[:, None] // HW
               == jnp.arange(g, dtype=jnp.int32)[None, :]).astype(jnp.float32)
        kernel = _make_segsum_kernel(g)
        in_specs = [x_spec, w_spec, pl.BlockSpec((L, g), lambda c, n: (0, 0))]
        operands = (x2, w2, seg)
        s_bytes = L * g * 4
        flops = N * C * HW + 2 * N * Cg * L * g

    vmem_plan = 2 * (x_blk + w_blk + s_bytes + o_blk) + (4 << 20)
    vmem_limit = int(max(32 << 20, min(vmem_plan, int(cap * 0.9))))

    cost = pl.CostEstimate(
        flops=int(flops),
        transcendentals=0,
        bytes_accessed=int(N * C * HW * x_item + C * HW * w_item + s_bytes + N * C * 4),
    )

    out = pl.pallas_call(
        kernel,
        out_shape=jax.ShapeDtypeStruct((N, Cg, g), jnp.float32),
        grid=grid,
        in_specs=in_specs,
        out_specs=out_spec,
        compiler_params=pltpu.CompilerParams(
            dimension_semantics=("parallel", "parallel"),
            vmem_limit_bytes=vmem_limit,
        ),
        cost_estimate=cost,
    )(*operands)

    return out.reshape(N, C, 1, 1).astype(x.dtype)


# ---------------------------------------------------------------------------
# Demo / correctness check
# ---------------------------------------------------------------------------
if __name__ == "__main__":
    # Main check: batch=2, channels=4, spatial=16x16 (lane-aligned path, g == 1).
    N, C, H, W = 2, 4, 16, 16
    mapper_x = [0, 1]
    mapper_y = [0, 1]
    assert C % len(mapper_x) == 0

    weight = get_dct_filter1(H, W, mapper_x, mapper_y, C)
    key = jax.random.PRNGKey(0)
    x = jax.random.normal(key, (N, C, H, W), dtype=jnp.float32)

    out = jax.block_until_ready(cdca_forward(x, weight))
    ref = jnp.sum(x * weight[None, :, :, :], axis=(2, 3))[:, :, None, None]
    assert out.shape == (N, C, 1, 1)
    assert jnp.allclose(out, ref, atol=1e-5, rtol=1e-5), "mismatch vs reference (16x16)"

    # Secondary check: 7x7 spatial map exercises the channel-folding path.
    N2, C2, H2, W2 = 2, 128, 7, 7
    weight2 = get_dct_filter1(H2, W2, [0, 1], [0, 1], C2)
    x2 = jax.random.normal(jax.random.PRNGKey(0), (N2, C2, H2, W2), dtype=jnp.float32)
    out2 = jax.block_until_ready(cdca_forward(x2, weight2))
    ref2 = jnp.sum(x2 * weight2[None, :, :, :], axis=(2, 3))[:, :, None, None]
    assert out2.shape == (N2, C2, 1, 1)
    assert jnp.allclose(out2, ref2, atol=1e-4, rtol=1e-4), "mismatch vs reference (7x7)"

    print("KERNEL_OK")
</pallas_src>

<mosaic_0001>
module attributes {stable_mosaic.version = 11 : i64} {
  func.func @_cdca_kernel_sum(%arg0: i32, %arg1: i32, %arg2: memref<1x4x256xf32, #tpu.memory_space<vmem>>, %arg3: memref<4x256xf32, #tpu.memory_space<vmem>>, %arg4: memref<1x4x1xf32, #tpu.memory_space<vmem>>) attributes {dimension_semantics = [#tpu.dimension_semantics<parallel>, #tpu.dimension_semantics<parallel>], iteration_bounds = array<i64: 1, 2>, scalar_prefetch = 0 : i64, scratch_operands = 0 : i64, tpu.core_type = #tpu.core_type<tc>, window_params = [{transform_indices = @transform_0, window_bounds = array<i64: 1, 4, 256>}, {transform_indices = @transform_1, window_bounds = array<i64: 4, 256>}, {transform_indices = @transform_2, window_bounds = array<i64: 1, 4, 1>}]} {
    %c0 = arith.constant 0 : index
    %c0_0 = arith.constant 0 : index
    %c0_1 = arith.constant 0 : index
    %0 = vector.load %arg2[%c0, %c0_0, %c0_1] : memref<1x4x256xf32, #tpu.memory_space<vmem>>, vector<1x4x256xf32>
    %c0_2 = arith.constant 0 : index
    %c0_3 = arith.constant 0 : index
    %1 = vector.load %arg3[%c0_2, %c0_3] : memref<4x256xf32, #tpu.memory_space<vmem>>, vector<4x256xf32>
    %2 = vector.shape_cast %1 : vector<4x256xf32> to vector<1x4x256xf32>
    %3 = arith.mulf %0, %2 : vector<1x4x256xf32>
    %cst = arith.constant dense<0.000000e+00> : vector<1x4xf32>
    %4 = vector.multi_reduction <add>, %3, %cst [2] : vector<1x4x256xf32> to vector<1x4xf32>
    %5 = vector.shape_cast %4 : vector<1x4xf32> to vector<1x4x1xf32>
    %c0_4 = arith.constant 0 : index
    %c0_5 = arith.constant 0 : index
    %c0_6 = arith.constant 0 : index
    %6 = vector.load %arg4[%c0_4, %c0_5, %c0_6] : memref<1x4x1xf32, #tpu.memory_space<vmem>>, vector<1x4x1xf32>
    tpu.vector_store %arg4[%c0_4, %c0_5, %c0_6], %5 {strides = array<i32>} : memref<1x4x1xf32, #tpu.memory_space<vmem>>, vector<1x4x1xf32>,
    return
  }
  func.func @transform_0(%arg0: i32, %arg1: i32) -> (i32, i32, i32) {
    %c0_i32 = arith.constant 0 : i32
    %c0_i32_0 = arith.constant 0 : i32
    return %arg1, %arg0, %c0_i32 : i32, i32, i32
  }
  func.func @transform_1(%arg0: i32, %arg1: i32) -> (i32, i32) {
    %c0_i32 = arith.constant 0 : i32
    %c0_i32_0 = arith.constant 0 : i32
    return %arg0, %c0_i32 : i32, i32
  }
  func.func @transform_2(%arg0: i32, %arg1: i32) -> (i32, i32, i32) {
    %c0_i32 = arith.constant 0 : i32
    %c0_i32_0 = arith.constant 0 : i32
    return %arg1, %arg0, %c0_i32 : i32, i32, i32
  }
}

</mosaic_0001>

<bundles_post_ra>
// kernel: tpu_custom_call.1
= control target key start
LH: loop header
LB: loop body
LE: loop exit
PB: predicated region body
PF: predicated region fallthrough
CT: control target
= control target key end

     0   :  { %7 = vsyncpa [#allocation3], 0  ;;  %s692_s0 = inlined_call_operand.hbm [shape: f32[2,4,256], index: 0, kind: input, shape index: {}]   ;;  %s693_s1 = inlined_call_operand.hbm [shape: f32[4,256], index: 1, kind: input, shape index: {}]   ;;  %s694_s2 = inlined_call_operand.vmem [shape: f32[2,4,1], index: 2, kind: output, shape index: {}]  }
   0x1   :  { %9 = vsyncpa [#allocation3 + $0x1], 0 }
   0x2   :  { %10 = vsyncpa [#allocation5], 0  ;;  %s529_s9 = smov 0   ;;  %s531_s10 = smov 0  }
   0x3   :  { %s533_s11 = smov 0   ;;  %s535_s12 = smov 0  }
   0x4   :  { %s537_s13 = smov 0   ;;  %s539_s14 = smov 0  }
   0x5 LB: > { %s317_s15 = sadd.s32 4294967295, %s510_s14   ;;  %p50_p0 = scmp.ne.s32.totalorder %s494_s10, %s490_s9  ;;  %s510_s14 = sphi %s539_s14, %s16_s14   ;;  %s506_s13 = sphi %s537_s13, %s713_s13   ;;  %s502_s12 = sphi %s535_s12, %s712_s12   ;;  %s498_s11 = sphi %s533_s11, %s711_s11   ;;  %s494_s10 = sphi %s531_s10, %s710_s10   ;;  %s490_s9 = sphi %s529_s9, %s709_s9  }
   0x6   : > { %p559_p1 = scmp.eq.s32.totalorder %s317_s15, 0  ;;  %p319_p2 = scmp.ge.s32.totalorder %s510_s14, 1 }
   0x7   : > { %p115_p3 = scmp.lt.s32.totalorder %s510_s14, 3  ;;  %s512_s19 = smov [#allocation4]  }
   0x8   : > { %s699_s16 = scalar_select %p559_p1, 1, 0 }
   0x9   : > { %p567_p4 = por %p559_p1, %p50_p0  ;;  %p571_p5 = pnand %p319_p2, %p115_p3 }
   0xa   : > { %s131_s20 = sshll.u32 %s512_s19, 4  ;;  %s25_s22 = sadd.s32 1, %s506_s13  ;;  %s132_s20 = int_to_ptr.vmem [resolvable:$true] %s131_s20 }
   0xb   : > { %s700_s17 = scalar_select %p567_p4, 1, 0 }
   0xc   : > { %s701_s18 = scalar_select %p571_p5, 1, 0 }
   0xd   : > { %p338_p6 = pneg %p571_p5  ;;  %s37_s23 = sadd.s32 1, %s498_s11 }
   0xe   : > { %p585_p8 = scmp.ge.s32.totalorder %s25_s22, 2  ;;  %s398_s27 = scalar_lea.hbm %s693_s1, 128 }
   0xf   : > { %p579_p7 = pnand %p338_p6, %p559_p1  ;;  %p399_p9 = scmp.ne.s32.totalorder %s693_s1, %s398_s27 }
  0x10   : > { %s703_s24 = scalar_select %p585_p8, 1, 0 }
  0x11   : > { %p400_p10 = pneg %p579_p7  ;;  %p405_p13 = scmp.lt.u32.totalorder %s398_s27, %s693_s1 }
  0x13   : > { %p401_p11 = pnand %p400_p10, %p399_p9 }
  0x15   : > { %p402_p12 = pneg %p401_p11 }
  0x17   : > { %p407_p0 = pnand %p405_p13, %p402_p12 }
  0x19   : > { %410 = shalt.err (!%p407_p0)
}
  0x1a   : > { %s411_s4 = scalar_lea.vmem %s132_s20, 128  ;;  %p419_p1 = scmp.lt.s32.totalorder %s132_s20, %s132_s20 }
  0x1b   : > { %p412_p2 = scmp.ne.s32.totalorder %s132_s20, %s411_s4  ;;  %p420_p4 = scmp.lt.s32.totalorder %s411_s4, %s411_s4 }
  0x1d   : > { %p414_p3 = pnand %p412_p2, %p400_p10  ;;  %p421_p5 = por %p420_p4, %p419_p1 }
  0x1f   : > { %p415_p6 = pneg %p414_p3 }
  0x21   : > { %p422_p8 = pnand %p421_p5, %p415_p6 }
  0x23   : > { %425 = shalt.err (!%p422_p8)
}
  0x24   : > { %341 = dma.hbm_to_vmem [thread:$0]  (!%p579_p7), %s693_s1, 128, %s132_s20, [#allocation5]  }
  0x25   : > { %p704_p9 = scmp.ne.s32.totalorder %s703_s24, 0  ;;  %p44_p1 = scmp.ne.s32.totalorder %s498_s11, %s494_s10 }
  0x26   : > { %p45_p4 = scmp.eq.s32.totalorder %s510_s14, 0  ;;  %p347_p5 = scmp.lt.s32.totalorder %s510_s14, 2 }
  0x27   : > { %s715_s22 = smov (%p704_p9, %s25_s22), 0  ;;  %s142_s8 = sand.u32 1, %s498_s11  }
  0x28   : > { %s32_s7 = ssub.s32 %s506_s13, %s715_s22  ;;  %p46_p10 = por %p45_p4, %p44_p1 }
  0x29   : > { %p35_p8 = scmp.eq.s32.totalorder %s32_s7, 0  ;;  %s331_s9 = sshll.u32 %s506_s13, 7 }
  0x2a   : > { %s322_s19 = sshll.u32 %s142_s8, 3  ;;  %s625_s20 = scalar_lea.hbm %s692_s0, %s331_s9 }
  0x2b   : > { %s620_s15 = scalar_select %p35_p8, %s498_s11, %s37_s23  }
  0x2c   : > { %s146_s24 = scalar_lea.vmem [#allocation2], %s322_s19  ;;  %p627_p7 = pnand %p347_p5, %p46_p10 }
  0x2d   : > { %s156_s26 = sshll.u32 %s146_s24, 4  ;;  %s143_s23 = scalar_lea.sflag [#allocation3], %s142_s8  ;;  %s631_s26 = int_to_ptr.vmem [resolvable:$true] %s156_s26 }
  0x2e   : > { %s426_s28 = scalar_lea.hbm %s625_s20, 128  ;;  %p428_p12 = pneg %p627_p7 }
  0x2f   : > { %p427_p11 = scmp.ne.s32.totalorder %s625_s20, %s426_s28  ;;  %s431_s3 = scalar_lea.hbm %s692_s0, 256 }
  0x30   : > { %p432_p2 = scmp.lt.u32.totalorder %s625_s20, %s692_s0  ;;  %p433_p3 = scmp.lt.u32.totalorder %s431_s3, %s426_s28 }
  0x31   : > { %p429_p13 = pnand %p428_p12, %p427_p11  ;;  %p435_p9 = scmp.lt.u32.totalorder %s426_s28, %s625_s20 }
  0x32   : > { %p434_p6 = por %p433_p3, %p432_p2 }
  0x33   : > { %p430_p0 = pneg %p429_p13 }
  0x34   : > { %p436_p1 = por %p435_p9, %p434_p6 }
  0x36   : > { %p437_p4 = pnand %p436_p1, %p430_p0 }
  0x38   : > { %440 = shalt.err (!%p437_p4)
}
  0x39   : > { %s441_s6 = scalar_lea.vmem %s631_s26, 128  ;;  %s513_s7 = smov [#allocation2]  }
  0x3a   : > { %p442_p5 = scmp.ne.s32.totalorder %s631_s26, %s441_s6  ;;  %s446_s8 = sshll.u32 %s513_s7, 4  ;;  %s447_s8 = int_to_ptr.vmem [resolvable:$false] %s446_s8 }
  0x3b   : > { %s448_s9 = scalar_lea.vmem %s447_s8, 256  ;;  %p449_p11 = scmp.lt.s32.totalorder %s631_s26, %s447_s8 }
  0x3c   : > { %p444_p8 = pnand %p442_p5, %p428_p12  ;;  %p450_p13 = scmp.lt.s32.totalorder %s448_s9, %s441_s6 }
  0x3e   : > { %p445_p10 = pneg %p444_p8  ;;  %p451_p2 = por %p450_p13, %p449_p11 }
  0x40   : > { %p452_p3 = pnand %p451_p2, %p445_p10 }
  0x42   : > { %455 = shalt.err (!%p452_p3)
}
  0x43   : > { %345 = dma.hbm_to_vmem [thread:$0]  (!%p627_p7), %s625_s20, 128, %s631_s26, %s143_s23  }
  0x44   : > { %p706_p0 = scmp.ne.s32.totalorder %s701_s18, 0 }
  0x45   : > { %s167_s19 = sand.u32 (!%p706_p0), 1, %s494_s10   ;;  %p707_p12 = scmp.ne.s32.totalorder (!%p706_p0), %s700_s17, 0 }
  0x46   : > { %165 = sbr.rel (%p706_p0) target bundleno = 232 (0xe8), region = 28  ;;  %s326_s21 = sshll.u32 (!%p706_p0), %s167_s19, 3 }
  0x47   : > { %s168_s25 = scalar_lea.sflag (!%p706_p0), [#allocation3], %s167_s19  ;;  %s171_s24 = scalar_lea.vmem (!%p706_p0), [#allocation2], %s326_s21 }
  0x4d   : > { %481 = dma.done.wait (%p707_p12), %s168_s25, 128  }
  0x4e   : > { %483 = vsyncadd (%p707_p12), %s168_s25, 4294967168  ;;  %p708_p6 = scmp.ne.s32.totalorder %s699_s16, 0 }
  0x50   : > { %485 = dma.done.wait (%p708_p6), [#allocation5], 128  }
  0x51   : > { %487 = vsyncadd (%p708_p6), [#allocation5], 4294967168  ;;  %v205_v0 = vld [vmem:[%s171_s24] sm:$0xff]  ;;  %v206_v1 = vld [vmem:[#allocation4] sm:$0xff]  ;;  %vm211_vm0 = vcmask 1043456   ;;  %p198_p7 = scmp.lt.s32.totalorder %s502_s12, 1 }
  0x52   : > { %v207_v2 = vmul.f32 %v206_v1, %v205_v0  ;;  %vm217_vm1 = vcmask 3072  }
  0x53   : > { %s717_s12 = smov (!%p198_p7, %s502_s12), 1 }
  0x54   : > { %v209_v3 = vcombine.high %v207_v2, %v207_v2  ;;  %v212_v4 = vsel %vm211_vm0, %v207_v2, 0.0  ;;  %s328_s17 = sshll.u32 %s717_s12, 2 }
  0x55   : > { %s204_s26 = scalar_lea.vmem %s694_s2, %s328_s17 }
  0x56   : > { %v213_v5 = vsel %vm211_vm0, %v209_v3, 0.0 }
  0x57   : > { %v214_v6 = vadd.f32 %v213_v5, %v212_v4 }
  0x59   : > { %215 = vadd.xlane.f32.xlu0 %v214_v6 }
  0xe6   : > { %v216_v7 = vpop.xlane.xlu0 %215 }
  0xe7   : > { %218 = vst.msk [vmem:[%s204_s26] sm:$0xf] %vm217_vm1, %v216_v7 }
  0xe8 PF: > { %s16_s14 = sadd.s32 1, %s510_s14   ;;  %s709_s9 = smov %s494_s10 }
  0xe9   : > { %p13_p9 = scmp.ge.s32.totalorder %s16_s14, 4   ;;  %s710_s10 = smov %s498_s11 }
  0xea   : > { %s711_s11 = smov %s620_s15  ;;  %s712_s12 = smov %s506_s13 }
  0xeb   : > { %s713_s13 = smov %s715_s22  ;;  %15 = sbr.rel (!%p13_p9) target bundleno = 5 (0x5), region = 73 }
  0xf2   :  { %244 = vsyncpa [#allocation3], 1 }
  0xf3   :  { %246 = vsyncpa [#allocation3 + $0x1], 1 }
  0xf4   :  { %247 = vsyncpa [#allocation5], 1 }

</bundles_post_ra>
